<compile_context>
chip_gen: v7x
topology: tpu7x:2x2x1
jax: 0.10.0
libtpu: 0.0.40
codegen_flags: <defaults>
</compile_context>

<pallas_src>
import math
import functools
import numpy as np
import jax
import jax.numpy as jnp
from jax.experimental import pallas as pl
from jax.experimental.pallas import tpu as pltpu


def mwn_loss_kernel(x_ref, tgt_ref, ws_ref, num_ref, den_ref, num_acc, den_acc,
                    *, gamma, beta, beta_type, n_classes, compute_den,
                    class_axis):
    i = pl.program_id(0)

    @pl.when(i == 0)
    def _init():
        num_acc[0, 0] = jnp.float32(0.0)
        den_acc[0, 0] = jnp.float32(0.0)

    x = x_ref[...].astype(jnp.float32)          # logits block
    tgt = tgt_ref[...]                          # int32 labels (broadcastable)
    w_samp = ws_ref[...].astype(jnp.float32)    # per-sample weight (0 on pad)

    # One-hot mask rebuilt in-register (no [N, C] one-hot shipped from HBM).
    classes = jax.lax.broadcasted_iota(jnp.int32, x.shape, class_axis)
    t = (classes == tgt).astype(jnp.float32)

    # Stable BCE-with-logits, reduction='none':
    #   max(x, 0) - x*t + log1p(exp(-|x|))
    sp = jnp.log1p(jnp.exp(-jnp.abs(x)))        # softplus(-|x|), reused below
    tx = t * x
    loss = jnp.maximum(x, 0.0) - tx + sp

    # beta thresholding (static Python branches -> specialized kernel)
    if beta > 0.0:
        th = -math.log(beta)
        if beta_type == 'zero':
            loss = jnp.where(loss <= th, loss, 0.0)
        elif beta_type == 'fix':
            loss = jnp.where(loss <= th, loss, th)
        elif beta_type == 'decrease':
            pt = jnp.exp(-loss)
            loss = jnp.where(loss <= th, loss, pt * th / beta)

    # focal modulator; log1p(exp(-x)) == relu(-x) + log1p(exp(-|x|)) reuses sp
    if gamma != 0.0:
        modulator = jnp.exp(-gamma * (tx + jnp.maximum(-x, 0.0) + sp))
        loss = modulator * loss

    weighted = loss * w_samp                    # weight broadcasts over classes
    num_acc[0, 0] += jnp.sum(weighted)
    if compute_den:
        # every weight "row" is constant across the C classes
        den_acc[0, 0] += jnp.sum(w_samp) * float(n_classes)

    # keep the (resident) scalar outputs up to date every step
    num_ref[0, 0] = num_acc[0, 0]
    den_ref[0, 0] = den_acc[0, 0]


_MAX_BLOCK_BYTES = 2 * 1024 * 1024


def _round_up(v, m):
    return (v + m - 1) // m * m


def _cdiv(a, b):
    return -(-a // b)


def _choose_tile_rows(n, c):
    cap = max(8, (_MAX_BLOCK_BYTES // max(1, 4 * c)) // 8 * 8)
    cap = min(cap, 4096)
    n_r = _round_up(max(n, 1), 8)
    nblk = _cdiv(n_r, cap)
    return _round_up(_cdiv(n_r, nblk), 8)


def _choose_tile_cols(n, c):
    cap = max(128, (_MAX_BLOCK_BYTES // max(1, 4 * c)) // 128 * 128)
    cap = min(cap, 65536)
    n_c = _round_up(max(n, 1), 128)
    nblk = _cdiv(n_c, cap)
    return _round_up(_cdiv(n_c, nblk), 128)


def mwn_loss(x, target, class_weights, *, gamma, beta, beta_type, sigmoid,
             tile_n=None, layout=None):
    """Pallas implementation of MWNLoss.forward."""
    if beta < 0.0 or beta > 0.4:
        raise AttributeError('For MWNLoss, beta must be within [0.0, 0.4].')
    n, c = x.shape
    if layout is None:
        layout = 'col' if c < 128 else 'row'

    compute_den = (sigmoid != 'enlarge')
    tgt = target.astype(jnp.int32)
    # Tiny glue: per-sample weight gather. Padded rows get weight 0 so they
    # contribute nothing to either reduction.
    w_samp = class_weights.astype(jnp.float32)[tgt]

    if layout == 'col':
        # Class-major, lane-dense: samples on the 128-lane axis.
        tile = (_choose_tile_cols(n, c) if tile_n is None
                else max(128, _round_up(int(tile_n), 128)))
        n_pad = _round_up(n, tile)
        xk = x.T                                  # [C, N]
        tgtk = tgt.reshape(1, n)
        wk = w_samp.reshape(1, n)
        if n_pad != n:
            pad = n_pad - n
            xk = jnp.pad(xk, ((0, 0), (0, pad)))
            tgtk = jnp.pad(tgtk, ((0, 0), (0, pad)))
            wk = jnp.pad(wk, ((0, 0), (0, pad)))
        in_specs = [
            pl.BlockSpec((c, tile), lambda i: (0, i)),     # logits
            pl.BlockSpec((1, tile), lambda i: (0, i)),     # int32 targets
            pl.BlockSpec((1, tile), lambda i: (0, i)),     # per-sample weights
        ]
        class_axis = 0
    else:
        # Row-major path (used when C >= 128: already lane-dense, no transpose).
        tile = (_choose_tile_rows(n, c) if tile_n is None
                else max(8, _round_up(int(tile_n), 8)))
        n_pad = _round_up(n, tile)
        xk = x
        tgtk = tgt.reshape(n, 1)
        wk = w_samp.reshape(n, 1)
        if n_pad != n:
            pad = n_pad - n
            xk = jnp.pad(xk, ((0, pad), (0, 0)))
            tgtk = jnp.pad(tgtk, ((0, pad), (0, 0)))
            wk = jnp.pad(wk, ((0, pad), (0, 0)))
        in_specs = [
            pl.BlockSpec((tile, c), lambda i: (i, 0)),
            pl.BlockSpec((tile, 1), lambda i: (i, 0)),
            pl.BlockSpec((tile, 1), lambda i: (i, 0)),
        ]
        class_axis = 1

    num_blocks = n_pad // tile
    kernel = functools.partial(
        mwn_loss_kernel, gamma=float(gamma), beta=float(beta),
        beta_type=beta_type, n_classes=c, compute_den=compute_den,
        class_axis=class_axis)

    num, den = pl.pallas_call(
        kernel,
        grid=(num_blocks,),
        in_specs=in_specs,
        out_specs=(
            pl.BlockSpec((1, 1), lambda i: (0, 0),
                         memory_space=pltpu.MemorySpace.SMEM),
            pl.BlockSpec((1, 1), lambda i: (0, 0),
                         memory_space=pltpu.MemorySpace.SMEM),
        ),
        out_shape=(jax.ShapeDtypeStruct((1, 1), jnp.float32),
                   jax.ShapeDtypeStruct((1, 1), jnp.float32)),
        scratch_shapes=[pltpu.SMEM((1, 1), jnp.float32),
                        pltpu.SMEM((1, 1), jnp.float32)],
        compiler_params=pltpu.CompilerParams(
            dimension_semantics=("arbitrary",),
            vmem_limit_bytes=32 * 1024 * 1024),
    )(xk, tgtk, wk)

    if sigmoid == 'enlarge':
        return (num[0, 0] / float(n * c)) * 30.0
    return num[0, 0] / den[0, 0]


def mwn_loss_ref(x, target, class_weights, *, gamma, beta, beta_type, sigmoid):
    """Pure-JAX reference mirroring the PyTorch forward."""
    n, c = x.shape
    t = jax.nn.one_hot(target, c, dtype=jnp.float32)
    w = class_weights.reshape(1, c).astype(jnp.float32)
    weights = jnp.sum(w * t, axis=1, keepdims=True) * jnp.ones((1, c))
    loss = jnp.maximum(x, 0.0) - x * t + jnp.log1p(jnp.exp(-jnp.abs(x)))
    if beta > 0.0:
        th = -math.log(beta)
        if beta_type == 'zero':
            loss = jnp.where(loss <= th, loss, 0.0)
        elif beta_type == 'fix':
            loss = jnp.where(loss <= th, loss, th)
        elif beta_type == 'decrease':
            pt = jnp.exp(-loss)
            loss = jnp.where(loss <= th, loss, pt * th / beta)
    if gamma != 0.0:
        loss = jnp.exp(-gamma * t * x - gamma * jnp.log1p(jnp.exp(-x))) * loss
    wl = weights * loss
    if sigmoid == 'enlarge':
        return jnp.mean(wl) * 30.0
    return jnp.sum(wl) / jnp.sum(weights)


def make_class_weights(num_class_list, extra_weight, power):
    # mirrors BaseLoss.reset_epoch with scheduler == 're_weight'
    num_class_list = np.asarray(num_class_list, dtype=np.float64)
    w = 1.0 / num_class_list
    w = w * np.asarray(extra_weight, dtype=np.float64)
    w = np.array([math.pow(v, power) for v in w])
    w = w / np.sum(w) * len(num_class_list)
    return jnp.asarray(w, dtype=jnp.float32)


if __name__ == "__main__":
    # synthetic configurations (para_dict equivalent), deterministic
    num_class_list_small = [100, 50, 20, 10]                      # C = 4
    cw_small = make_class_weights(num_class_list_small, [1.0] * 4, 1.0)

    rng = np.random.RandomState(0)
    num_class_list_big = rng.randint(5, 500, size=160).tolist()   # C = 160
    cw_big = make_class_weights(num_class_list_big, [1.0] * 160, 1.0)

    key = jax.random.PRNGKey(0)
    kx, kt = jax.random.split(key)

    configs = [
        dict(gamma=2.0, beta=0.2, beta_type='fix', sigmoid='normal'),
        dict(gamma=2.0, beta=0.2, beta_type='decrease', sigmoid='enlarge'),
        dict(gamma=0.0, beta=0.3, beta_type='zero', sigmoid='normal'),
        dict(gamma=1.5, beta=0.0, beta_type='fix', sigmoid='normal'),
    ]

    # (n, class_weights, tile_n, layout, config indices)
    cases = [
        (8,   cw_small, None, None,  [0, 1, 2, 3]),  # auto 'col', single block
        (300, cw_small, 128,  None,  [0, 1]),         # 'col': 3 blocks + padding
        (40,  cw_small, 16,   'row', [0, 2]),         # row path: 3 blocks + pad
        (24,  cw_big,   8,    None,  [0, 1]),         # C=160 -> auto 'row'
    ]

    all_ok = True
    for n, cw, tile, layout, cfg_idx in cases:
        c = int(cw.shape[0])
        x = jax.random.normal(kx, (n, c), dtype=jnp.float32) * 2.0
        target = jax.random.randint(kt, (n,), 0, c, dtype=jnp.int32)
        for ci in cfg_idx:
            cfg = configs[ci]
            out = mwn_loss(x, target, cw, tile_n=tile, layout=layout, **cfg)
            out = jax.block_until_ready(out)
            ref = mwn_loss_ref(x, target, cw, **cfg)
            if not np.allclose(np.asarray(out), np.asarray(ref),
                               rtol=1e-5, atol=1e-6):
                all_ok = False
                print("MISMATCH", n, c, tile, layout, cfg, float(out), float(ref))

    assert all_ok
    print("KERNEL_OK")
</pallas_src>

<mosaic_0001>
module attributes {stable_mosaic.version = 11 : i64} {
  func.func @mwn_loss_kernel(%arg0: i32, %arg1: memref<4x128xf32, #tpu.memory_space<vmem>>, %arg2: memref<1x128xi32, #tpu.memory_space<vmem>>, %arg3: memref<1x128xf32, #tpu.memory_space<vmem>>, %arg4: memref<1x1xf32, #tpu.memory_space<smem>>, %arg5: memref<1x1xf32, #tpu.memory_space<smem>>, %arg6: memref<1x1xf32, #tpu.memory_space<smem>>, %arg7: memref<1x1xf32, #tpu.memory_space<smem>>) attributes {dimension_semantics = [#tpu.dimension_semantics<arbitrary>], iteration_bounds = array<i64: 1>, scalar_prefetch = 0 : i64, scratch_operands = 2 : i64, tpu.core_type = #tpu.core_type<tc>, window_params = [{transform_indices = @transform_0, window_bounds = array<i64: 4, 128>}, {transform_indices = @transform_1, window_bounds = array<i64: 1, 128>}, {transform_indices = @transform_2, window_bounds = array<i64: 1, 128>}, {transform_indices = @transform_3, window_bounds = array<i64: 1, 1>}, {transform_indices = @transform_4, window_bounds = array<i64: 1, 1>}]} {
    %c0_i32 = arith.constant 0 : i32
    %0 = arith.cmpi eq, %arg0, %c0_i32 : i32
    %1 = arith.extui %0 : i1 to i32
    %c0_i32_0 = arith.constant 0 : i32
    %2 = arith.cmpi ne, %1, %c0_i32_0 : i32
    scf.if %2 {
      %cst_31 = arith.constant 0.000000e+00 : f32
      %c0_32 = arith.constant 0 : index
      %c0_33 = arith.constant 0 : index
      %56 = memref.load %arg6[%c0_32, %c0_33] : memref<1x1xf32, #tpu.memory_space<smem>>
      memref.store %cst_31, %arg6[%c0_32, %c0_33] : memref<1x1xf32, #tpu.memory_space<smem>>
      %cst_34 = arith.constant 0.000000e+00 : f32
      %c0_35 = arith.constant 0 : index
      %c0_36 = arith.constant 0 : index
      %57 = memref.load %arg7[%c0_35, %c0_36] : memref<1x1xf32, #tpu.memory_space<smem>>
      memref.store %cst_34, %arg7[%c0_35, %c0_36] : memref<1x1xf32, #tpu.memory_space<smem>>
    } else {
    }
    %c0 = arith.constant 0 : index
    %c0_1 = arith.constant 0 : index
    %3 = vector.load %arg1[%c0, %c0_1] : memref<4x128xf32, #tpu.memory_space<vmem>>, vector<4x128xf32>
    %c0_2 = arith.constant 0 : index
    %c0_3 = arith.constant 0 : index
    %4 = vector.load %arg2[%c0_2, %c0_3] : memref<1x128xi32, #tpu.memory_space<vmem>>, vector<1x128xi32>
    %c0_4 = arith.constant 0 : index
    %c0_5 = arith.constant 0 : index
    %5 = vector.load %arg3[%c0_4, %c0_5] : memref<1x128xf32, #tpu.memory_space<vmem>>, vector<1x128xf32>
    %6 = tpu.iota {dimensions = array<i32: 0>} : vector<4x128xi32>
    %7 = vector.broadcast %4 : vector<1x128xi32> to vector<4x128xi32>
    %8 = arith.cmpi eq, %6, %7 : vector<4x128xi32>
    %9 = arith.extui %8 : vector<4x128xi1> to vector<4x128xi32>
    %10 = arith.sitofp %9 : vector<4x128xi32> to vector<4x128xf32>
    %11 = math.absf %3 : vector<4x128xf32>
    %cst = arith.constant 0.000000e+00 : f32
    %12 = vector.broadcast %cst : f32 to vector<4x128xf32>
    %13 = arith.subf %12, %11 : vector<4x128xf32>
    %14 = math.exp %13 : vector<4x128xf32>
    %15 = math.log1p %14 : vector<4x128xf32>
    %16 = arith.mulf %10, %3 : vector<4x128xf32>
    %cst_6 = arith.constant 0.000000e+00 : f32
    %17 = vector.broadcast %cst_6 : f32 to vector<4x128xf32>
    %18 = arith.maximumf %3, %17 : vector<4x128xf32>
    %19 = arith.subf %18, %16 : vector<4x128xf32>
    %20 = arith.addf %19, %15 : vector<4x128xf32>
    %cst_7 = arith.constant 1.60943794 : f32
    %21 = vector.broadcast %cst_7 : f32 to vector<4x128xf32>
    %22 = arith.cmpf ole, %20, %21 : vector<4x128xf32>
    %cst_8 = arith.constant 1.60943794 : f32
    %23 = vector.broadcast %cst_8 : f32 to vector<4x128xf32>
    %24 = arith.select %22, %20, %23 : vector<4x128xi1>, vector<4x128xf32>
    %cst_9 = arith.constant 0.000000e+00 : f32
    %25 = vector.broadcast %cst_9 : f32 to vector<4x128xf32>
    %26 = arith.subf %25, %3 : vector<4x128xf32>
    %cst_10 = arith.constant 0.000000e+00 : f32
    %27 = vector.broadcast %cst_10 : f32 to vector<4x128xf32>
    %28 = arith.maximumf %26, %27 : vector<4x128xf32>
    %29 = arith.addf %16, %28 : vector<4x128xf32>
    %30 = arith.addf %29, %15 : vector<4x128xf32>
    %cst_11 = arith.constant -2.000000e+00 : f32
    %31 = vector.broadcast %cst_11 : f32 to vector<4x128xf32>
    %32 = arith.mulf %31, %30 : vector<4x128xf32>
    %33 = math.exp %32 : vector<4x128xf32>
    %34 = arith.mulf %33, %24 : vector<4x128xf32>
    %35 = vector.broadcast %5 : vector<1x128xf32> to vector<4x128xf32>
    %36 = arith.mulf %34, %35 : vector<4x128xf32>
    %c0_12 = arith.constant 0 : index
    %c0_13 = arith.constant 0 : index
    %37 = memref.load %arg6[%c0_12, %c0_13] : memref<1x1xf32, #tpu.memory_space<smem>>
    %38 = vector.shape_cast %36 : vector<4x128xf32> to vector<1x4x128xf32>
    %cst_14 = arith.constant dense<0.000000e+00> : vector<1xf32>
    %39 = vector.multi_reduction <add>, %38, %cst_14 [1, 2] : vector<1x4x128xf32> to vector<1xf32>
    %40 = vector.shape_cast %39 : vector<1xf32> to vector<1x1x1xf32>
    %41 = vector.extract %40[0, 0, 0] : f32 from vector<1x1x1xf32>
    %42 = arith.addf %37, %41 : f32
    %c0_15 = arith.constant 0 : index
    %c0_16 = arith.constant 0 : index
    %43 = memref.load %arg6[%c0_15, %c0_16] : memref<1x1xf32, #tpu.memory_space<smem>>
    memref.store %42, %arg6[%c0_15, %c0_16] : memref<1x1xf32, #tpu.memory_space<smem>>
    %c0_17 = arith.constant 0 : index
    %c0_18 = arith.constant 0 : index
    %44 = memref.load %arg7[%c0_17, %c0_18] : memref<1x1xf32, #tpu.memory_space<smem>>
    %45 = vector.shape_cast %5 : vector<1x128xf32> to vector<1x1x128xf32>
    %cst_19 = arith.constant dense<0.000000e+00> : vector<1xf32>
    %46 = vector.multi_reduction <add>, %45, %cst_19 [1, 2] : vector<1x1x128xf32> to vector<1xf32>
    %47 = vector.shape_cast %46 : vector<1xf32> to vector<1x1x1xf32>
    %48 = vector.extract %47[0, 0, 0] : f32 from vector<1x1x1xf32>
    %cst_20 = arith.constant 4.000000e+00 : f32
    %49 = arith.mulf %48, %cst_20 : f32
    %50 = arith.addf %44, %49 : f32
    %c0_21 = arith.constant 0 : index
    %c0_22 = arith.constant 0 : index
    %51 = memref.load %arg7[%c0_21, %c0_22] : memref<1x1xf32, #tpu.memory_space<smem>>
    memref.store %50, %arg7[%c0_21, %c0_22] : memref<1x1xf32, #tpu.memory_space<smem>>
    %c0_23 = arith.constant 0 : index
    %c0_24 = arith.constant 0 : index
    %52 = memref.load %arg6[%c0_23, %c0_24] : memref<1x1xf32, #tpu.memory_space<smem>>
    %c0_25 = arith.constant 0 : index
    %c0_26 = arith.constant 0 : index
    %53 = memref.load %arg4[%c0_25, %c0_26] : memref<1x1xf32, #tpu.memory_space<smem>>
    memref.store %52, %arg4[%c0_25, %c0_26] : memref<1x1xf32, #tpu.memory_space<smem>>
    %c0_27 = arith.constant 0 : index
    %c0_28 = arith.constant 0 : index
    %54 = memref.load %arg7[%c0_27, %c0_28] : memref<1x1xf32, #tpu.memory_space<smem>>
    %c0_29 = arith.constant 0 : index
    %c0_30 = arith.constant 0 : index
    %55 = memref.load %arg5[%c0_29, %c0_30] : memref<1x1xf32, #tpu.memory_space<smem>>
    memref.store %54, %arg5[%c0_29, %c0_30] : memref<1x1xf32, #tpu.memory_space<smem>>
    return
  }
  func.func @transform_0(%arg0: i32) -> (i32, i32) {
    %c0_i32 = arith.constant 0 : i32
    %c0_i32_0 = arith.constant 0 : i32
    return %c0_i32, %arg0 : i32, i32
  }
  func.func @transform_1(%arg0: i32) -> (i32, i32) {
    %c0_i32 = arith.constant 0 : i32
    %c0_i32_0 = arith.constant 0 : i32
    return %c0_i32, %arg0 : i32, i32
  }
  func.func @transform_2(%arg0: i32) -> (i32, i32) {
    %c0_i32 = arith.constant 0 : i32
    %c0_i32_0 = arith.constant 0 : i32
    return %c0_i32, %arg0 : i32, i32
  }
  func.func @transform_3(%arg0: i32) -> (i32, i32) {
    %c0_i32 = arith.constant 0 : i32
    %c0_i32_0 = arith.constant 0 : i32
    %c0_i32_1 = arith.constant 0 : i32
    return %c0_i32, %c0_i32_0 : i32, i32
  }
  func.func @transform_4(%arg0: i32) -> (i32, i32) {
    %c0_i32 = arith.constant 0 : i32
    %c0_i32_0 = arith.constant 0 : i32
    %c0_i32_1 = arith.constant 0 : i32
    return %c0_i32, %c0_i32_0 : i32, i32
  }
}

</mosaic_0001>

<bundles_post_ra>
// kernel: tpu_custom_call.1
= control target key start
LH: loop header
LB: loop body
LE: loop exit
PB: predicated region body
PF: predicated region fallthrough
CT: control target
= control target key end

     0   :  { %10 = vsyncpa [#allocation5], 0  ;;  %s282_s0 = inlined_call_operand.hbm [shape: f32[4,128], index: 0, kind: input, shape index: {}]   ;;  %s283_s1 = inlined_call_operand.vmem [shape: s32[1,128], index: 1, kind: input, shape index: {}]   ;;  %s284_s2 = inlined_call_operand.vmem [shape: f32[1,128], index: 2, kind: input, shape index: {}]   ;;  %s285_s3 = inlined_call_operand.hbm [shape: f32[1,1], index: 3, kind: output, shape index: {0}]   ;;  %s286_s4 = inlined_call_operand.hbm [shape: f32[1,1], index: 4, kind: output, shape index: {1}]  }
   0x1   :  { %11 = vsyncpa [#allocation6], 0 }
   0x2   :  { %12 = vsyncpa [#allocation9], 0  ;;  %s211_s15 = smov [#allocation4]   ;;  %s163_s19 = scalar_lea.hbm %s282_s0, 64 }
   0x3   :  { %s19_s16 = sshll.u32 %s211_s15, 4  ;;  %p164_p0 = scmp.ne.s32.totalorder %s282_s0, %s163_s19  ;;  %s20_s16 = int_to_ptr.vmem [resolvable:$true] %s19_s16 }
   0x4   :  { %p167_p1 = scmp.lt.u32.totalorder %s163_s19, %s282_s0 }
   0x6   :  { %p169_p2 = pnand %p167_p1, %p164_p0 }
   0x8   :  { %172 = shalt.err (!%p169_p2)
}
   0x9   :  { %s173_s24 = scalar_lea.vmem %s20_s16, 64  ;;  %p178_p4 = scmp.lt.s32.totalorder %s20_s16, %s20_s16 }
   0xa   :  { %p174_p3 = scmp.ne.s32.totalorder %s20_s16, %s173_s24  ;;  %p179_p5 = scmp.lt.s32.totalorder %s173_s24, %s173_s24 }
   0xc   :  { %p180_p6 = por %p179_p5, %p178_p4 }
   0xe   :  { %p181_p7 = pnand %p180_p6, %p174_p3 }
  0x10   :  { %184 = shalt.err (!%p181_p7)
}
  0x11   :  { %22 = dma.hbm_to_vmem [thread:$0]  %s282_s0, 64, %s20_s16, [#allocation5]  }
  0x12   :  { %205 = dma.done.wait [#allocation5], 64  }
  0x13   :  { %206 = vsyncadd [#allocation5], 4294967232  ;;  %v38_v0 = vld [vmem:[#allocation4] sm:$0xf]  ;;  %v41_v4 = vlaneseq  ;;  %v212_v11 = vmov 0.0   ;;  %vm85_vm3 = vcmask 1043456  }
  0x14   :  { %v50_v1 = vand.u32 2147483647, %v38_v0  ;;  %v147_v7 = vld [vmem:[%s283_s1] ss:$0 sm:$0xff]  ;;  %v69_v10 = vsub.f32 0.0, %v38_v0  ;;  %v64_v22 = vmax.f32 %v38_v0, 0.0 }
  0x15   :  { %v42_v5 = vshrl.u32 %v41_v4, 7  ;;  %v40_v29 = vld [vmem:[%s284_s2] sm:$0x1]  ;;  %vm100_vm4 = vcmask 1040384   ;;  %s185_s5 = scalar_lea.hbm %s285_s3, 16 }
  0x16   :  { %v51_v2 = vsub.f32 0.0, %v50_v1  ;;  %v70_v16 = vmax.f32 %v69_v10, 0.0  ;;  %v101_v36 = vsel %vm100_vm4, %v40_v29, 0.0  ;;  %p186_p8 = scmp.ne.s32.totalorder %s285_s3, %s185_s5  ;;  %p189_p9 = scmp.lt.u32.totalorder %s185_s5, %s285_s3 }
  0x17   :  { %vm47_vm0 = vcmp.eq.s32.totalorder %v42_v5, %v147_v7  ;;  %v80_v28 = vsub.s32 0, %v42_v5 }
  0x18   :  { %v52_v3 = vmul.f32 1.442695, %v51_v2  ;;  %v148_v12 = vsel %vm47_vm0, 1.0, %v212_v11  ;;  %p191_p10 = pnand %p189_p9, %p186_p8 }
  0x19   :  { %v63_v15 = vmul.f32 %v148_v12, %v38_v0  ;;  %v81_v31 = vrot.slane %v40_v29, %v80_v28 }
  0x1a   :  { %157 = vpow2.f32 %v52_v3 }
  0x1b   :  { %v71_v19 = vadd.f32 %v70_v16, %v63_v15  ;;  %v65_v25 = vsub.f32 %v64_v22, %v63_v15 }
  0x24   :  { %v158_v6 = vpop.eup %157 }
  0x25   :  { %v54_v8 = vadd.f32 1.0, %v158_v6  ;;  %v57_v9 = vmul.f32 -0.5, %v158_v6  ;;  %v60_v14 = vand.u32 2147483647, %v158_v6 }
  0x27   :  { %159 = vlog2.f32 %v54_v8  ;;  %v58_v13 = vadd.f32 1.0, %v57_v9  ;;  %vm61_vm1 = vcmp.lt.f32.partialorder %v60_v14, 0.0004427343 }
  0x29   :  { %v59_v17 = vmul.f32 %v158_v6, %v58_v13 }
  0x31   :  { %v160_v18 = vpop.eup %159 }
  0x32   :  { %v56_v20 = vmul.f32 0.6931472, %v160_v18 }
  0x34   :  { %v62_v21 = vsel %vm61_vm1, %v59_v17, %v56_v20 }
  0x35   :  { %v72_v23 = vadd.f32 %v71_v19, %v62_v21  ;;  %v66_v27 = vadd.f32 %v65_v25, %v62_v21 }
  0x37   :  { %v73_v24 = vmul.f32 -2.0, %v72_v23  ;;  %vm67_vm2 = vcmp.le.f32.partialorder %v66_v27, 1.609438 }
  0x38   :  { %v68_v30 = vsel %vm67_vm2, %v66_v27, 1.609438 }
  0x39   :  { %v74_v26 = vmul.f32 1.442695, %v73_v24 }
  0x3b   :  { %161 = vpow2.f32 %v74_v26 }
  0x45   :  { %v162_v32 = vpop.eup %161 }
  0x46   :  { %v76_v33 = vmul.f32 %v162_v32, %v68_v30 }
  0x48   :  { %v83_v34 = vmul.f32 %v81_v31, %v76_v33 }
  0x4a   :  { %v86_v35 = vsel %vm85_vm3, %v83_v34, 0.0 }
  0x4b   :  { %87 = vadd.xlane.f32.xlu0 %v86_v35 }
  0x4f   :  { %102 = vadd.xlane.f32.xlu0 %v101_v36 }
  0xd8   :  { %v88_v37 = vpop.xlane.xlu0 %87 }
  0xd9   :  { %v89_v38 = vrot.slane %v88_v37, 4 }
  0xdb   :  { %v90_v39 = vadd.f32 %v89_v38, %v88_v37 }
  0xdc   :  { %v103_v40 = vpop.xlane.xlu0 %102 }
  0xdd   :  { %v91_v41 = vrot.slane %v90_v39, 2  ;;  %v104_v42 = vrot.slane %v103_v40, 4 }
  0xdf   :  { %v105_v43 = vadd.f32 %v104_v42, %v103_v40  ;;  %v92_v44 = vadd.f32 %v91_v41, %v90_v39 }
  0xe1   :  { %v106_v45 = vrot.slane %v105_v43, 2  ;;  %v93_v46 = vrot.slane %v92_v44, 1 }
  0xe3   :  { %v107_v47 = vadd.f32 %v106_v45, %v105_v43  ;;  %v94_v48 = vadd.f32 %v93_v46, %v92_v44 }
  0xe5   :  { %149 = vpush %v94_v48  ;;  %v108_v49 = vrot.slane %v107_v47, 1 }
  0xe7   :  { %v109_v50 = vadd.f32 %v108_v49, %v107_v47 }
  0xe9   :  { %151 = vpush %v109_v50 }
 0x116   :  { %s150_s2 = spop %149 }
 0x117   :  { %117 = sst [smem:[#allocation7]] %s150_s2 }
 0x118   :  { %194 = shalt.err (!%p191_p10)
}
 0x119   :  { %s213_s10 = smov [#allocation7]   ;;  %s195_s17 = scalar_lea.hbm %s286_s4, 16 }
 0x11a   :  { %128 = dma.smem_to_hbm %s213_s10, 16, %s285_s3, [#allocation6]  }
 0x11b   :  { %s152_s13 = spop %151  ;;  %p196_p11 = scmp.ne.s32.totalorder %s286_s4, %s195_s17 }
 0x11c   :  { %s111_s14 = smul.f32 4.0, %s152_s13  ;;  %p199_p12 = scmp.lt.u32.totalorder %s195_s17, %s286_s4 }
 0x11e   :  { %120 = sst [smem:[#allocation8]] %s111_s14  ;;  %p201_p13 = pnand %p199_p12, %p196_p11 }
 0x120   :  { %204 = shalt.err (!%p201_p13)
}
 0x121   :  { %s214_s22 = smov [#allocation8]  }
 0x122   :  { %136 = dma.smem_to_hbm %s214_s22, 16, %s286_s4, [#allocation9]  }
 0x123   :  { %207 = dma.done.wait [#allocation6], 16  }
 0x124   :  { %208 = vsyncadd [#allocation6], 4294967280 }
 0x125   :  { %209 = dma.done.wait [#allocation9], 16  }
 0x126   :  { %210 = vsyncadd [#allocation9], 4294967280 }
 0x127   :  { %143 = sfence }
 0x128   :  { %144 = vsyncpa [#allocation5], 1 }
 0x129   :  { %145 = vsyncpa [#allocation6], 1 }
 0x12a   :  { %146 = vsyncpa [#allocation9], 1 }

</bundles_post_ra>
